<compile_context>
chip_gen: v7x
topology: tpu7x:2x2x1
jax: 0.10.0
libtpu: 0.0.40
codegen_flags: <defaults>
</compile_context>

<pallas_src>
import jax
import jax.numpy as jnp
from jax.experimental import pallas as pl
from jax.experimental.pallas import tpu as pltpu


def _round_up(a, m):
    return ((a + m - 1) // m) * m


# ---------------------------------------------------------------------------
# Kernel 1: h = x @ Wt + b   (computed once, emitted in the MXU compute dtype)
# ---------------------------------------------------------------------------
def linear_kernel(x_ref, wt_ref, b_ref, h_ref):
    h = jnp.dot(x_ref[...], wt_ref[...], preferred_element_type=jnp.float32)
    h_ref[...] = (h + b_ref[...]).astype(h_ref.dtype)


# ---------------------------------------------------------------------------
# Kernel 2: out = adj @ h    (tiled; f32 accumulation into resident out block)
# ---------------------------------------------------------------------------
def aggregate_kernel(adj_ref, h_ref, o_ref):
    k = pl.program_id(1)
    partial = jnp.dot(adj_ref[...], h_ref[...],
                      preferred_element_type=jnp.float32)

    @pl.when(k == 0)
    def _first():
        o_ref[...] = partial

    @pl.when(k > 0)
    def _accumulate():
        o_ref[...] += partial


def gcn_conv(x, w, b, adj, *, tm=1024, tk=1024,
             compute_dtype=jnp.bfloat16,
             vmem_limit_bytes=32 * 1024 * 1024):
    """out = adj @ (x @ w.T + b).

    x:   [n, in_c]      node features
    w:   [out_c, in_c]  nn.Linear weight convention
    b:   [out_c]        nn.Linear bias
    adj: [n, n]         dense adjacency
    """
    n, in_c = x.shape
    out_c = w.shape[0]
    out_dtype = x.dtype

    # ---- tile / padding geometry --------------------------------------------
    in_c_pad = _round_up(in_c, 128)
    out_c_pad = _round_up(out_c, 128)

    # Clamp tiles for small graphs (bounded padding waste), keep lane-dense
    # 128 alignment. Rows and the reduction dim are padded independently, so
    # tm != tk is fine. (v7x note: keep tm/tk <= 2048 for its 64 MiB VMEM.)
    tm_eff = min(tm, _round_up(n, 128))
    tk_eff = min(tk, _round_up(n, 128))
    n_rows_pad = _round_up(n, tm_eff)     # adj rows  == out rows
    n_cols_pad = _round_up(n, tk_eff)     # adj cols  == h rows

    # ---- small operands: pad + cast unconditionally (tiny vs. adj) ----------
    xp = jnp.zeros((n_cols_pad, in_c_pad), compute_dtype).at[:n, :in_c].set(
        x.astype(compute_dtype))
    # Pre-transposed weight [in_c_pad, out_c_pad] -> no in-kernel .T / XLU.
    wtp = jnp.zeros((in_c_pad, out_c_pad), compute_dtype).at[:in_c, :out_c].set(
        w.T.astype(compute_dtype))
    bp = jnp.zeros((1, out_c_pad), jnp.float32).at[0, :out_c].set(
        b.astype(jnp.float32))

    # adj is the dominant HBM stream: avoid a separate padded copy when the
    # shape is already tile aligned; the bf16 cast can then fuse into the
    # pallas_call input DMA (allow_input_fusion below).
    if (n_rows_pad, n_cols_pad) == adj.shape:
        adjp = adj.astype(compute_dtype)
    else:
        adjp = jnp.zeros((n_rows_pad, n_cols_pad), compute_dtype).at[:n, :n].set(
            adj.astype(compute_dtype))

    # ---- kernel 1: h = x @ Wt + b (computed once) ----------------------------
    # Padded x rows are zero, so padded h rows equal the bias; those rows meet
    # zero adj columns in kernel 2, so the result stays exact.
    h = pl.pallas_call(
        linear_kernel,
        out_shape=jax.ShapeDtypeStruct((n_cols_pad, out_c_pad), compute_dtype),
        grid_spec=pltpu.PrefetchScalarGridSpec(
            num_scalar_prefetch=0,
            grid=(n_cols_pad // tk_eff,),
            in_specs=[
                pl.BlockSpec((tk_eff, in_c_pad), lambda i: (i, 0)),
                pl.BlockSpec((in_c_pad, out_c_pad), lambda i: (0, 0)),
                pl.BlockSpec((1, out_c_pad), lambda i: (0, 0)),
            ],
            out_specs=pl.BlockSpec((tk_eff, out_c_pad), lambda i: (i, 0)),
        ),
        compiler_params=pltpu.CompilerParams(
            dimension_semantics=("parallel",),
            vmem_limit_bytes=vmem_limit_bytes),
    )(xp, wtp, bp)

    # ---- kernel 2: out = adj @ h ---------------------------------------------
    grid = (n_rows_pad // tm_eff, n_cols_pad // tk_eff)

    out_p = pl.pallas_call(
        aggregate_kernel,
        out_shape=jax.ShapeDtypeStruct((n_rows_pad, out_c_pad), jnp.float32),
        grid_spec=pltpu.PrefetchScalarGridSpec(
            num_scalar_prefetch=0,
            grid=grid,
            in_specs=[
                # adj tiled over (row tile i, reduction tile k)
                pl.BlockSpec((tm_eff, tk_eff), lambda i, k: (i, k)),
                # h rows follow the reduction axis
                pl.BlockSpec((tk_eff, out_c_pad), lambda i, k: (k, 0)),
            ],
            # Output block constant over k -> stays resident in VMEM and is
            # accumulated into directly (no scratch accumulator needed).
            out_specs=pl.BlockSpec((tm_eff, out_c_pad), lambda i, k: (i, 0)),
        ),
        compiler_params=pltpu.CompilerParams(
            # Row axis shards across TensorCores; reduction stays sequential.
            dimension_semantics=("parallel", "arbitrary"),
            vmem_limit_bytes=vmem_limit_bytes,
            # Let the bf16 cast of adj fuse into the kernel input stream.
            allow_input_fusion=[True, True]),
    )(adjp, h)

    return out_p[:n, :out_c].astype(out_dtype)


def _quantized_ref(x, w, b, adj, cd=jnp.bfloat16):
    """Reference applying the same bf16 operand quantization as the kernels."""
    xq = x.astype(cd).astype(jnp.float32)
    wtq = w.T.astype(cd).astype(jnp.float32)
    adjq = adj.astype(cd).astype(jnp.float32)
    hq = (xq @ wtq + b[None, :]).astype(cd).astype(jnp.float32)
    return adjq @ hq


if __name__ == "__main__":
    key = jax.random.PRNGKey(0)

    def make_case(key, n, in_c, out_c):
        k_x, k_adj, k_w, k_b = jax.random.split(key, 4)
        x = jax.random.normal(k_x, (n, in_c), dtype=jnp.float32)
        adj = jax.random.uniform(k_adj, (n, n), dtype=jnp.float32)
        adj = (adj + adj.T) * 0.5
        # nn.Linear(in_c, out_c): weight [out, in], bias [out]
        w = jax.random.normal(k_w, (out_c, in_c), dtype=jnp.float32) * 0.1
        b = jax.random.normal(k_b, (out_c,), dtype=jnp.float32) * 0.1
        return x, w, b, adj

    ok = True

    # Case 1: module-sized example (single tile after padding to 128).
    k1, k2 = jax.random.split(key)
    x, w, b, adj = make_case(k1, n=16, in_c=32, out_c=32)
    out = gcn_conv(x, w, b, adj)
    jax.block_until_ready(out)
    ok &= out.shape == (16, 32)
    ref_q = _quantized_ref(x, w, b, adj)
    ok &= bool(jnp.allclose(out, ref_q, atol=2e-2, rtol=2e-2))
    ref = adj @ (x @ w.T + b)
    ok &= bool(jnp.allclose(out, ref, atol=2e-1, rtol=2e-2))

    # Case 2: exercises the multi-tile grid, the k>0 accumulation path, and
    # the no-copy (cast-only) adjacency path (256 is already tile aligned).
    x, w, b, adj = make_case(k2, n=256, in_c=32, out_c=32)
    out = gcn_conv(x, w, b, adj, tm=128, tk=128)
    jax.block_until_ready(out)
    ok &= out.shape == (256, 32)
    ref_q = _quantized_ref(x, w, b, adj)
    ok &= bool(jnp.allclose(out, ref_q, atol=2e-2, rtol=2e-2))
    ref = adj @ (x @ w.T + b)
    ok &= bool(jnp.allclose(out, ref, atol=2.5e-1, rtol=2e-2))

    assert ok, "GCNConv Pallas kernel mismatch vs reference"
    print("KERNEL_OK")
</pallas_src>

<mosaic_0001>
module attributes {stable_mosaic.version = 11 : i64} {
  func.func @linear_kernel(%arg0: i32, %arg1: memref<128x128xbf16, #tpu.memory_space<vmem>>, %arg2: memref<128x128xbf16, #tpu.memory_space<vmem>>, %arg3: memref<1x128xf32, #tpu.memory_space<vmem>>, %arg4: memref<128x128xbf16, #tpu.memory_space<vmem>>) attributes {dimension_semantics = [#tpu.dimension_semantics<parallel>], iteration_bounds = array<i64: 1>, scalar_prefetch = 0 : i64, scratch_operands = 0 : i64, tpu.core_type = #tpu.core_type<tc>, window_params = [{transform_indices = @transform_0, window_bounds = array<i64: 128, 128>}, {pipeline_mode = #tpu.pipeline_mode<synchronous>, transform_indices = @transform_1, window_bounds = array<i64: 128, 128>}, {pipeline_mode = #tpu.pipeline_mode<synchronous>, transform_indices = @transform_2, window_bounds = array<i64: 1, 128>}, {transform_indices = @transform_3, window_bounds = array<i64: 128, 128>}]} {
    %c0 = arith.constant 0 : index
    %c0_0 = arith.constant 0 : index
    %0 = vector.load %arg1[%c0, %c0_0] : memref<128x128xbf16, #tpu.memory_space<vmem>>, vector<128x128xbf16>
    %c0_1 = arith.constant 0 : index
    %c0_2 = arith.constant 0 : index
    %1 = vector.load %arg2[%c0_1, %c0_2] : memref<128x128xbf16, #tpu.memory_space<vmem>>, vector<128x128xbf16>
    %cst = arith.constant dense<0.000000e+00> : vector<128x128xf32>
    %2 = tpu.matmul %0, %1, %cst {dimension_numbers = #tpu.dot_dimension_numbers<[1], [0], [0], [1], [0, 0, 1, 1], [], []>} : vector<128x128xbf16>, vector<128x128xbf16>, vector<128x128xf32> -> vector<128x128xf32>
    %c0_3 = arith.constant 0 : index
    %c0_4 = arith.constant 0 : index
    %3 = vector.load %arg3[%c0_3, %c0_4] : memref<1x128xf32, #tpu.memory_space<vmem>>, vector<1x128xf32>
    %4 = vector.broadcast %3 : vector<1x128xf32> to vector<128x128xf32>
    %5 = arith.addf %2, %4 : vector<128x128xf32>
    %6 = arith.truncf %5 : vector<128x128xf32> to vector<128x128xbf16>
    %c0_5 = arith.constant 0 : index
    %c0_6 = arith.constant 0 : index
    %7 = vector.load %arg4[%c0_5, %c0_6] : memref<128x128xbf16, #tpu.memory_space<vmem>>, vector<128x128xbf16>
    tpu.vector_store %arg4[%c0_5, %c0_6], %6 {strides = array<i32>} : memref<128x128xbf16, #tpu.memory_space<vmem>>, vector<128x128xbf16>,
    return
  }
  func.func @transform_0(%arg0: i32) -> (i32, i32) {
    %c0_i32 = arith.constant 0 : i32
    %c0_i32_0 = arith.constant 0 : i32
    return %arg0, %c0_i32 : i32, i32
  }
  func.func @transform_1(%arg0: i32) -> (i32, i32) {
    %c0_i32 = arith.constant 0 : i32
    %c0_i32_0 = arith.constant 0 : i32
    %c0_i32_1 = arith.constant 0 : i32
    return %c0_i32, %c0_i32_0 : i32, i32
  }
  func.func @transform_2(%arg0: i32) -> (i32, i32) {
    %c0_i32 = arith.constant 0 : i32
    %c0_i32_0 = arith.constant 0 : i32
    %c0_i32_1 = arith.constant 0 : i32
    return %c0_i32, %c0_i32_0 : i32, i32
  }
  func.func @transform_3(%arg0: i32) -> (i32, i32) {
    %c0_i32 = arith.constant 0 : i32
    %c0_i32_0 = arith.constant 0 : i32
    return %arg0, %c0_i32 : i32, i32
  }
}

</mosaic_0001>

<bundles_post_ra>
// kernel: tpu_custom_call.1
= control target key start
LH: loop header
LB: loop body
LE: loop exit
PB: predicated region body
PF: predicated region fallthrough
CT: control target
= control target key end

     0   :  { %8 = vsyncpa [#allocation3], 0  ;;  %s700_s0 = inlined_call_operand.hbm [shape: bf16[128,128], index: 0, kind: input, shape index: {}]   ;;  %s701_s1 = inlined_call_operand.hbm [shape: bf16[128,128], index: 1, kind: input, shape index: {}]   ;;  %s702_s2 = inlined_call_operand.vmem [shape: f32[1,128], index: 2, kind: input, shape index: {}]   ;;  %s703_s3 = inlined_call_operand.hbm [shape: bf16[128,128], index: 3, kind: output, shape index: {}]  }
   0x1   :  { %9 = vsyncpa [#allocation6], 0 }
   0x2   :  { %10 = vsyncpa [#allocation4], 0  ;;  %s627_s12 = smov [#allocation2]   ;;  %s555_s16 = scalar_lea.hbm %s700_s0, 1024 }
   0x3   :  { %s16_s13 = sshll.u32 %s627_s12, 4  ;;  %p556_p0 = scmp.ne.s32.totalorder %s700_s0, %s555_s16  ;;  %s17_s13 = int_to_ptr.vmem [resolvable:$true] %s16_s13 }
   0x4   :  { %p559_p1 = scmp.lt.u32.totalorder %s555_s16, %s700_s0 }
   0x6   :  { %p561_p2 = pnand %p559_p1, %p556_p0 }
   0x8   :  { %564 = shalt.err (!%p561_p2)
}
   0x9   :  { %s565_s21 = scalar_lea.vmem %s17_s13, 1024  ;;  %p570_p4 = scmp.lt.s32.totalorder %s17_s13, %s17_s13 }
   0xa   :  { %p566_p3 = scmp.ne.s32.totalorder %s17_s13, %s565_s21  ;;  %p571_p5 = scmp.lt.s32.totalorder %s565_s21, %s565_s21 }
   0xc   :  { %p572_p6 = por %p571_p5, %p570_p4 }
   0xe   :  { %p573_p7 = pnand %p572_p6, %p566_p3 }
  0x10   :  { %576 = shalt.err (!%p573_p7)
}
  0x11   :  { %s628_s22 = smov 64   ;;  %s629_s23 = smov 4  }
  0x12   :  { %22 = dma.hbm_to_vmem [thread:$0]  %s700_s0, 1024, %s17_s13, [#allocation3], %s628_s22, %s628_s22, %s629_s23  }
  0x13   :  { %s630_s26 = smov [#allocation5]   ;;  %s577_s30 = scalar_lea.hbm %s701_s1, 1024 }
  0x14   :  { %s28_s27 = sshll.u32 %s630_s26, 4  ;;  %p578_p8 = scmp.ne.s32.totalorder %s701_s1, %s577_s30  ;;  %s29_s27 = int_to_ptr.vmem [resolvable:$true] %s28_s27 }
  0x15   :  { %p581_p9 = scmp.lt.u32.totalorder %s577_s30, %s701_s1 }
  0x17   :  { %p583_p10 = pnand %p581_p9, %p578_p8 }
  0x19   :  { %586 = shalt.err (!%p583_p10)
}
  0x1a   :  { %s587_s8 = scalar_lea.vmem %s29_s27, 1024  ;;  %p592_p12 = scmp.lt.s32.totalorder %s29_s27, %s29_s27 }
  0x1b   :  { %p588_p11 = scmp.ne.s32.totalorder %s29_s27, %s587_s8  ;;  %p593_p13 = scmp.lt.s32.totalorder %s587_s8, %s587_s8 }
  0x1d   :  { %p594_p0 = por %p593_p13, %p592_p12 }
  0x1f   :  { %p595_p1 = pnand %p594_p0, %p588_p11 }
  0x21   :  { %598 = shalt.err (!%p595_p1)
}
  0x22   :  { %34 = dma.hbm_to_vmem [thread:$0]  %s701_s1, 1024, %s29_s27, [#allocation6], %s628_s22, %s628_s22, %s629_s23  }
  0x23   :  { %621 = dma.done.wait [#allocation3], 1024  }
  0x24   :  { %622 = vsyncadd [#allocation3], 4294966272 }
  0x25   :  { %623 = dma.done.wait [#allocation6], 1024  }
  0x26   :  { %624 = vsyncadd [#allocation6], 4294966272  ;;  %v539_v0 = vld [vmem:[#allocation5] sm:$0xff]   ;;  %v540_v1 = vld [vmem:[#allocation5 + $0x8] sm:$0xff]  }
  0x27   :  { %486 = vmatprep.subr.bf16.mxu0 %v539_v0  ;;  %518 = vmatprep.subr.bf16.mxu1 %v539_v0  ;;  %v541_v2 = vld [vmem:[#allocation5 + $0x10] sm:$0xff]   ;;  %v542_v3 = vld [vmem:[#allocation5 + $0x18] sm:$0xff]   ;;  %v547_v4 = vld [vmem:[#allocation2] sm:$0xff]  }
  0x28   :  { %487 = vmatpush3.bf16.msra.mxu0 %v539_v0  ;;  %526 = vmatpush3.bf16.msra.mxu1 %v539_v0  ;;  %v548_v5 = vld [vmem:[#allocation2 + $0x20] sm:$0xff]   ;;  %v544_v7 = vld [vmem:[#allocation5 + $0x28] sm:$0xff]   ;;  %v545_v8 = vld [vmem:[#allocation5 + $0x30] sm:$0xff]  }
  0x29   :  { %488 = vmatprep.subr.bf16.mxu0 %v540_v1  ;;  %519 = vmatprep.subr.bf16.mxu1 %v540_v1  ;;  %v543_v6 = vld [vmem:[#allocation5 + $0x20] sm:$0xff]   ;;  %v546_v9 = vld [vmem:[#allocation5 + $0x38] sm:$0xff]   ;;  %v549_v10 = vld [vmem:[#allocation2 + $0x8] sm:$0xff]  }
  0x2a   :  { %502 = vmatprep.mubr.bf16.mxu0 %v547_v4  ;;  %510 = vmatprep.mubr.bf16.mxu1 %v548_v5  ;;  %v550_v11 = vld [vmem:[#allocation2 + $0x28] sm:$0xff]   ;;  %v551_v12 = vld [vmem:[#allocation2 + $0x10] sm:$0xff]   ;;  %v553_v14 = vld [vmem:[#allocation2 + $0x18] sm:$0xff]  }
  0x2b   :  { %v552_v13 = vld [vmem:[#allocation2 + $0x30] sm:$0xff]   ;;  %v554_v15 = vld [vmem:[#allocation2 + $0x38] sm:$0xff]   ;;  %v374_v17 = vld [vmem:[%s702_s2] ss:$0 sm:$0xff]  ;;  %s631_s2 = smov [#allocation7]  }
  0x2c   :  { %489 = vmatpush3.bf16.msra.mxu0 %v540_v1  ;;  %527 = vmatpush3.bf16.msra.mxu1 %v540_v1  ;;  %s361_s11 = sshll.u32 %s631_s2, 4  ;;  %s362_s11 = int_to_ptr.vmem [resolvable:$true] %s361_s11 }
  0x2d   :  { %490 = vmatprep.subr.bf16.mxu0 %v541_v2  ;;  %520 = vmatprep.subr.bf16.mxu1 %v541_v2  ;;  %s599_s12 = scalar_lea.vmem %s362_s11, 1024  ;;  %p604_p3 = scmp.lt.s32.totalorder %s362_s11, %s362_s11 }
  0x2e   :  { %p600_p2 = scmp.ne.s32.totalorder %s362_s11, %s599_s12  ;;  %p605_p4 = scmp.lt.s32.totalorder %s599_s12, %s599_s12 }
  0x30   :  { %491 = vmatpush3.bf16.msra.mxu0 %v541_v2  ;;  %528 = vmatpush3.bf16.msra.mxu1 %v541_v2  ;;  %p606_p5 = por %p605_p4, %p604_p3 }
  0x31   :  { %492 = vmatprep.subr.bf16.mxu0 %v542_v3  ;;  %521 = vmatprep.subr.bf16.mxu1 %v542_v3 }
  0x32   :  { %p607_p6 = pnand %p606_p5, %p600_p2 }
  0x34   :  { %493 = vmatpush3.bf16.msra.mxu0 %v542_v3  ;;  %529 = vmatpush3.bf16.msra.mxu1 %v542_v3 }
  0x35   :  { %494 = vmatprep.subr.bf16.mxu0 %v543_v6  ;;  %522 = vmatprep.subr.bf16.mxu1 %v543_v6 }
  0x38   :  { %495 = vmatpush3.bf16.msra.mxu0 %v543_v6  ;;  %530 = vmatpush3.bf16.msra.mxu1 %v543_v6 }
  0x39   :  { %496 = vmatprep.subr.bf16.mxu0 %v544_v7  ;;  %523 = vmatprep.subr.bf16.mxu1 %v544_v7 }
  0x3c   :  { %497 = vmatpush3.bf16.msra.mxu0 %v544_v7  ;;  %531 = vmatpush3.bf16.msra.mxu1 %v544_v7 }
  0x3d   :  { %498 = vmatprep.subr.bf16.mxu0 %v545_v8  ;;  %524 = vmatprep.subr.bf16.mxu1 %v545_v8 }
  0x40   :  { %499 = vmatpush3.bf16.msra.mxu0 %v545_v8  ;;  %532 = vmatpush3.bf16.msra.mxu1 %v545_v8 }
  0x41   :  { %500 = vmatprep.subr.bf16.mxu0 %v546_v9  ;;  %525 = vmatprep.subr.bf16.mxu1 %v546_v9 }
  0x44   :  { %501 = vmatpush3.bf16.msra.mxu0 %v546_v9  ;;  %533 = vmatpush3.bf16.msra.mxu1 %v546_v9 }
  0x47   :  { %503 = vmatmul.mubr.bf16.vlgmr.msra.gmra.mrb[0].mxu0 %v549_v10  ;;  %511 = vmatmul.mubr.bf16.vlgmr.msra.gmra.mrb[0].mxu1 %v550_v11 }
  0x48   :  { %506 = vmatprep.mubr.bf16.mxu0 %v551_v12  ;;  %514 = vmatprep.mubr.bf16.mxu1 %v552_v13 }
  0x4f   :  { %507 = vmatmul.mubr.bf16.gmra.mrb[4].mxu0 %v553_v14  ;;  %515 = vmatmul.mubr.bf16.gmra.mrb[4].mxu1 %v554_v15 }
 0x11a   :  { %v504_v16 = vpop.f32.mrb[0].mxu0  ;;  %v512_v18 = vpop.f32.mrb[0].mxu1 }
 0x11b   :  { %v213_v19 = vpop.f32.mrb[1].mxu0  ;;  %v245_v20 = vpop.f32.mrb[1].mxu1  ;;  %v222_v23 = vadd.f32 %v504_v16, %v374_v17  ;;  %v254_v24 = vadd.f32 %v512_v18, %v374_v17 }
 0x11c   :  { %v505_v21 = vpop.f32.mrb[2].mxu0  ;;  %v513_v22 = vpop.f32.mrb[2].mxu1  ;;  %v214_v29 = vadd.f32 %v374_v17, %v213_v19  ;;  %v246_v30 = vadd.f32 %v374_v17, %v245_v20 }
 0x11d   :  { %v225_v25 = vadd.f32 %v505_v21, %v374_v17  ;;  %v257_v26 = vadd.f32 %v513_v22, %v374_v17  ;;  %v216_v27 = vpop.f32.mrb[3].mxu0  ;;  %v248_v28 = vpop.f32.mrb[3].mxu1 }
 0x11e   :  { %v217_v31 = vadd.f32 %v374_v17, %v216_v27  ;;  %v249_v32 = vadd.f32 %v374_v17, %v248_v28 }
 0x11f   :  { %v431_v33 = vpack.c.bf16 %v225_v25, %v222_v23  ;;  %v451_v34 = vpack.c.bf16 %v257_v26, %v254_v24 }
 0x120   :  { %v426_v35 = vpack.c.bf16 %v217_v31, %v214_v29  ;;  %v446_v36 = vpack.c.bf16 %v249_v32, %v246_v30 }
 0x121   :  { %463 = vst [vmem:[#allocation7 + $0x8] sm:$0xff] %v431_v33   ;;  %467 = vst [vmem:[#allocation7 + $0x28] sm:$0xff] %v451_v34  }
 0x122   :  { %427 = vst [vmem:[#allocation7] sm:$0xff] %v426_v35   ;;  %466 = vst [vmem:[#allocation7 + $0x20] sm:$0xff] %v446_v36   ;;  %v508_v37 = vpop.f32.mrb[4].mxu0  ;;  %v516_v38 = vpop.f32.mrb[4].mxu1 }
 0x123   :  { %v229_v39 = vpop.f32.mrb[5].mxu0  ;;  %v261_v40 = vpop.f32.mrb[5].mxu1  ;;  %v238_v43 = vadd.f32 %v508_v37, %v374_v17  ;;  %v270_v44 = vadd.f32 %v516_v38, %v374_v17 }
 0x124   :  { %v509_v41 = vpop.f32.mrb[6].mxu0  ;;  %v517_v42 = vpop.f32.mrb[6].mxu1  ;;  %v230_v49 = vadd.f32 %v374_v17, %v229_v39  ;;  %v262_v50 = vadd.f32 %v374_v17, %v261_v40 }
 0x125   :  { %v241_v45 = vadd.f32 %v509_v41, %v374_v17  ;;  %v273_v46 = vadd.f32 %v517_v42, %v374_v17  ;;  %v232_v47 = vpop.f32.mrb[7].mxu0  ;;  %v264_v48 = vpop.f32.mrb[7].mxu1 }
 0x126   :  { %v233_v51 = vadd.f32 %v374_v17, %v232_v47  ;;  %v265_v52 = vadd.f32 %v374_v17, %v264_v48 }
 0x127   :  { %v441_v53 = vpack.c.bf16 %v241_v45, %v238_v43  ;;  %v461_v54 = vpack.c.bf16 %v273_v46, %v270_v44 }
 0x128   :  { %v436_v55 = vpack.c.bf16 %v233_v51, %v230_v49  ;;  %v456_v56 = vpack.c.bf16 %v265_v52, %v262_v50 }
 0x129   :  { %465 = vst [vmem:[#allocation7 + $0x18] sm:$0xff] %v441_v53   ;;  %469 = vst [vmem:[#allocation7 + $0x38] sm:$0xff] %v461_v54  }
 0x12a   :  { %464 = vst [vmem:[#allocation7 + $0x10] sm:$0xff] %v436_v55   ;;  %468 = vst [vmem:[#allocation7 + $0x30] sm:$0xff] %v456_v56  }
 0x12b   :  { %610 = shalt.err (!%p607_p6)
}
 0x12c   :  { %s611_s15 = scalar_lea.hbm %s703_s3, 1024 }
 0x12d   :  { %p612_p7 = scmp.ne.s32.totalorder %s703_s3, %s611_s15  ;;  %p615_p8 = scmp.lt.u32.totalorder %s611_s15, %s703_s3 }
 0x12f   :  { %p617_p9 = pnand %p615_p8, %p612_p7 }
 0x131   :  { %620 = shalt.err (!%p617_p9)
}
 0x132   :  { %367 = dma.vmem_to_hbm [thread:$0]  %s362_s11, 1024, %s703_s3, [#allocation4], %s628_s22, %s628_s22, %s629_s23  }
 0x133   :  { %625 = dma.done.wait [#allocation4], 1024  }
 0x134   :  { %626 = vsyncadd [#allocation4], 4294966272 }
 0x135   :  { %371 = vsyncpa [#allocation3], 1 }
 0x136   :  { %372 = vsyncpa [#allocation6], 1 }
 0x137   :  { %373 = vsyncpa [#allocation4], 1 }

</bundles_post_ra>
